<compile_context>
chip_gen: v6e
topology: v6e:2x2x1
jax: 0.10.0
libtpu: 0.0.40
codegen_flags: <defaults>
</compile_context>

<pallas_src>
import functools

import jax
import jax.numpy as jnp
from jax.experimental import pallas as pl
from jax.experimental.pallas import tpu as pltpu


def _round_up(x, m):
    return ((x + m - 1) // m) * m


def _choose_batch_tile(B, block_b):
    """Per-grid-step batch tile.

    Small B -> one full-batch block (full-dim blocks have no alignment rules).
    Large B -> multiple-of-128 tile (legal lane-dense (1, tb) output block),
    capped at ~ceil(B/2) so v7x can shard the parallel axis across its 2 TCs.
    """
    if B <= 256:
        return B
    tb = min(block_b, _round_up(pl.cdiv(B, 2), 128))
    tb = max(128, (tb // 128) * 128)
    return tb


def _mlp2_kernel(eg_ref, ht_ref, w1g_ref, w1h_ref, b1_ref, w2_ref, b2_ref,
                 out_ref):
    # Layer 1, concat-free: two MXU matmuls into one f32 result.
    #   h = e_g @ W1[:E] + h_t @ W1[E:] + b1
    h = jnp.dot(eg_ref[...], w1g_ref[...], preferred_element_type=jnp.float32)
    h = h + jnp.dot(ht_ref[...], w1h_ref[...],
                    preferred_element_type=jnp.float32)
    h = h + b1_ref[...]                                   # (1, E) broadcast, f32

    # LeakyReLU, negative_slope = 0.01: max(h, 0.01*h) == where(h>0, h, 0.01*h).
    h = jnp.maximum(h, jnp.float32(0.01) * h)

    # Layer 2 (out_features == 1), lane-dense: contract E of w2_row (1, E) with
    # E of h (TB, E) -> (1, TB) row (same dot_general pattern as q @ k^T).
    y = jax.lax.dot_general(w2_ref[...], h, (((1,), (1,)), ((), ())),
                            preferred_element_type=jnp.float32)
    y = y + b2_ref[0]                                      # SMEM scalar bias

    out_ref[...] = y.astype(out_ref.dtype)                 # (1, TB) dense store


@functools.partial(jax.jit, static_argnames=("stream_dtype", "block_b"))
def mlp2_forward(e_g, h_t, w1, b1, w2, b2, *, stream_dtype=None, block_b=4096):
    """MLP2 forward pass as one Pallas TPU kernel, tiled over the batch.

    e_g, h_t : (B, E)
    w1       : (2E, E), b1 : (1, E)
    w2       : (E, 1),  b2 : (1, 1)
    returns  : (B, 1) logits in e_g.dtype
    """
    B, E = e_g.shape
    assert h_t.shape == (B, E)
    assert w1.shape == (2 * E, E) and b1.shape == (1, E)
    assert w2.shape == (E, 1) and b2.shape == (1, 1)

    # Stream activations in their incoming dtype unless the caller explicitly
    # opts into something else (a wrapper-side cast is an extra full HBM pass).
    sdt = jnp.dtype(e_g.dtype) if stream_dtype is None else jnp.dtype(stream_dtype)
    eg_s = e_g if e_g.dtype == sdt else e_g.astype(sdt)
    ht_s = h_t if h_t.dtype == sdt else h_t.astype(sdt)

    # Weight-side layout plumbing (tiny tensors; negligible cost).
    w1_g = w1[:E, :].astype(sdt)                    # (E, E)
    w1_h = w1[E:, :].astype(sdt)                    # (E, E)
    b1_f = b1.astype(jnp.float32)                   # (1, E), post-matmul f32
    w2_row = w2.reshape(1, E).astype(jnp.float32)   # (1, E)
    b2_s = b2.reshape(1).astype(jnp.float32)        # SMEM scalar

    tb = _choose_batch_tile(B, block_b)
    num_blocks = pl.cdiv(B, tb)
    out_cols = num_blocks * tb                      # lane-dense output slab

    batch_spec = pl.BlockSpec((tb, E), lambda i: (i, 0))
    resident = lambda shape: pl.BlockSpec(shape, lambda i: (0, 0))

    out = pl.pallas_call(
        _mlp2_kernel,
        out_shape=jax.ShapeDtypeStruct((1, out_cols), e_g.dtype),
        grid=(num_blocks,),
        in_specs=[
            batch_spec,                                        # e_g   (tb, E)
            batch_spec,                                        # h_t   (tb, E)
            resident((E, E)),                                  # W1[:E]
            resident((E, E)),                                  # W1[E:]
            resident((1, E)),                                  # b1
            resident((1, E)),                                  # w2 row
            pl.BlockSpec(memory_space=pltpu.MemorySpace.SMEM), # b2 scalar
        ],
        out_specs=pl.BlockSpec((1, tb), lambda i: (0, i)),
        compiler_params=pltpu.CompilerParams(
            dimension_semantics=("parallel",)),
    )(eg_s, ht_s, w1_g, w1_h, b1_f, w2_row, b2_s)

    # Reshape the lane-dense slab back to (B, 1); drop ragged-tail garbage rows.
    flat = out.reshape(-1)
    if out_cols != B:
        flat = flat[:B]
    return flat.reshape(B, 1)


def init_params(key, embed_dim, dtype=jnp.float32):
    """Deterministic synthetic parameter init (shapes match the nn.Linear layers)."""
    k1, k2, k3, k4 = jax.random.split(key, 4)
    # Linear(2E, E)
    lim1 = 1.0 / jnp.sqrt(2.0 * embed_dim)
    w1 = jax.random.uniform(k1, (2 * embed_dim, embed_dim), dtype, -lim1, lim1)
    b1 = jax.random.uniform(k2, (1, embed_dim), dtype, -lim1, lim1)
    # Linear(E, 1)
    lim2 = 1.0 / jnp.sqrt(float(embed_dim))
    w2 = jax.random.uniform(k3, (embed_dim, 1), dtype, -lim2, lim2)
    b2 = jax.random.uniform(k4, (1, 1), dtype, -lim2, lim2)
    return w1, b1, w2, b2


def reference_forward(e_g, h_t, w1, b1, w2, b2):
    """Pure-JAX f32 reference matching the PyTorch module semantics."""
    x = jnp.concatenate([e_g, h_t], axis=-1)
    h = x @ w1 + b1
    h = jnp.where(h > 0, h, 0.01 * h)
    return h @ w2 + b2


if __name__ == "__main__":
    embed_dim = 32
    batch = 8

    key = jax.random.PRNGKey(0)
    k_eg, k_ht, k_par = jax.random.split(key, 3)

    e_g = jax.random.normal(k_eg, (batch, embed_dim), jnp.float32)
    h_t = jax.random.normal(k_ht, (batch, embed_dim), jnp.float32)
    w1, b1, w2, b2 = init_params(k_par, embed_dim)
    ref = reference_forward(e_g, h_t, w1, b1, w2, b2)

    # 1) Default path: streams the incoming f32 directly (no wrapper cast).
    out_f32 = jax.block_until_ready(mlp2_forward(e_g, h_t, w1, b1, w2, b2))
    assert out_f32.shape == (batch, 1), out_f32.shape
    assert out_f32.dtype == e_g.dtype
    assert jnp.allclose(out_f32, ref, atol=1e-5, rtol=1e-5), (out_f32, ref)

    # 2) Opt-in bf16 streaming (perf config when the producer emits bf16).
    out_bf16 = jax.block_until_ready(
        mlp2_forward(e_g, h_t, w1, b1, w2, b2, stream_dtype=jnp.bfloat16))
    assert out_bf16.shape == (batch, 1), out_bf16.shape
    assert jnp.allclose(out_bf16, ref, atol=5e-2, rtol=5e-2), (out_bf16, ref)

    # 3) Larger, non-multiple batch: default tiling (tb=512, 2 blocks, ragged
    #    last block handled by boundary clipping, no jnp.pad).
    big_b = 1000
    kb1, kb2 = jax.random.split(jax.random.PRNGKey(1))
    e_g_b = jax.random.normal(kb1, (big_b, embed_dim), jnp.float32)
    h_t_b = jax.random.normal(kb2, (big_b, embed_dim), jnp.float32)
    ref_b = reference_forward(e_g_b, h_t_b, w1, b1, w2, b2)
    out_b = jax.block_until_ready(mlp2_forward(e_g_b, h_t_b, w1, b1, w2, b2))
    assert out_b.shape == (big_b, 1), out_b.shape
    assert jnp.allclose(out_b, ref_b, atol=1e-4, rtol=1e-4)

    # 4) Same batch with a smaller tile to exercise a 4-step ragged grid.
    out_b4 = jax.block_until_ready(
        mlp2_forward(e_g_b, h_t_b, w1, b1, w2, b2, block_b=256))
    assert out_b4.shape == (big_b, 1), out_b4.shape
    assert jnp.allclose(out_b4, ref_b, atol=1e-4, rtol=1e-4)

    print("KERNEL_OK")
</pallas_src>

<mosaic_0001>
module attributes {stable_mosaic.version = 11 : i64} {
  func.func @_mlp2_kernel(%arg0: i32, %arg1: memref<8x32xf32, #tpu.memory_space<vmem>>, %arg2: memref<8x32xf32, #tpu.memory_space<vmem>>, %arg3: memref<32x32xf32, #tpu.memory_space<vmem>>, %arg4: memref<32x32xf32, #tpu.memory_space<vmem>>, %arg5: memref<1x32xf32, #tpu.memory_space<vmem>>, %arg6: memref<1x32xf32, #tpu.memory_space<vmem>>, %arg7: memref<1xf32, #tpu.memory_space<smem>>, %arg8: memref<1x8xf32, #tpu.memory_space<vmem>>) attributes {dimension_semantics = [#tpu.dimension_semantics<parallel>], iteration_bounds = array<i64: 1>, scalar_prefetch = 0 : i64, scratch_operands = 0 : i64, tpu.core_type = #tpu.core_type<tc>, window_params = [{transform_indices = @transform_0, window_bounds = array<i64: 8, 32>}, {transform_indices = @transform_1, window_bounds = array<i64: 8, 32>}, {pipeline_mode = #tpu.pipeline_mode<synchronous>, transform_indices = @transform_2, window_bounds = array<i64: 32, 32>}, {pipeline_mode = #tpu.pipeline_mode<synchronous>, transform_indices = @transform_3, window_bounds = array<i64: 32, 32>}, {pipeline_mode = #tpu.pipeline_mode<synchronous>, transform_indices = @transform_4, window_bounds = array<i64: 1, 32>}, {pipeline_mode = #tpu.pipeline_mode<synchronous>, transform_indices = @transform_5, window_bounds = array<i64: 1, 32>}, {transform_indices = @transform_6, window_bounds = array<i64: 1>}, {transform_indices = @transform_7, window_bounds = array<i64: 1, 8>}]} {
    %c0 = arith.constant 0 : index
    %c0_0 = arith.constant 0 : index
    %0 = vector.load %arg1[%c0, %c0_0] : memref<8x32xf32, #tpu.memory_space<vmem>>, vector<8x32xf32>
    %c0_1 = arith.constant 0 : index
    %c0_2 = arith.constant 0 : index
    %1 = vector.load %arg3[%c0_1, %c0_2] : memref<32x32xf32, #tpu.memory_space<vmem>>, vector<32x32xf32>
    %cst = arith.constant dense<0.000000e+00> : vector<8x32xf32>
    %2 = tpu.matmul %0, %1, %cst {dimension_numbers = #tpu.dot_dimension_numbers<[1], [0], [0], [1], [0, 0, 1, 1], [], []>} : vector<8x32xf32>, vector<32x32xf32>, vector<8x32xf32> -> vector<8x32xf32>
    %c0_3 = arith.constant 0 : index
    %c0_4 = arith.constant 0 : index
    %3 = vector.load %arg2[%c0_3, %c0_4] : memref<8x32xf32, #tpu.memory_space<vmem>>, vector<8x32xf32>
    %c0_5 = arith.constant 0 : index
    %c0_6 = arith.constant 0 : index
    %4 = vector.load %arg4[%c0_5, %c0_6] : memref<32x32xf32, #tpu.memory_space<vmem>>, vector<32x32xf32>
    %cst_7 = arith.constant dense<0.000000e+00> : vector<8x32xf32>
    %5 = tpu.matmul %3, %4, %cst_7 {dimension_numbers = #tpu.dot_dimension_numbers<[1], [0], [0], [1], [0, 0, 1, 1], [], []>} : vector<8x32xf32>, vector<32x32xf32>, vector<8x32xf32> -> vector<8x32xf32>
    %6 = arith.addf %2, %5 : vector<8x32xf32>
    %c0_8 = arith.constant 0 : index
    %c0_9 = arith.constant 0 : index
    %7 = vector.load %arg5[%c0_8, %c0_9] : memref<1x32xf32, #tpu.memory_space<vmem>>, vector<1x32xf32>
    %8 = vector.broadcast %7 : vector<1x32xf32> to vector<8x32xf32>
    %9 = arith.addf %6, %8 : vector<8x32xf32>
    %cst_10 = arith.constant 0.00999999977 : f32
    %10 = vector.broadcast %cst_10 : f32 to vector<8x32xf32>
    %11 = arith.mulf %10, %9 : vector<8x32xf32>
    %12 = arith.maximumf %9, %11 : vector<8x32xf32>
    %c0_11 = arith.constant 0 : index
    %c0_12 = arith.constant 0 : index
    %13 = vector.load %arg6[%c0_11, %c0_12] : memref<1x32xf32, #tpu.memory_space<vmem>>, vector<1x32xf32>
    %cst_13 = arith.constant dense<0.000000e+00> : vector<1x8xf32>
    %14 = tpu.matmul %13, %12, %cst_13 {dimension_numbers = #tpu.dot_dimension_numbers<[1], [1], [0], [0], [0, 0, 1, 0], [], []>} : vector<1x32xf32>, vector<8x32xf32>, vector<1x8xf32> -> vector<1x8xf32>
    %c0_14 = arith.constant 0 : index
    %15 = memref.load %arg7[%c0_14] : memref<1xf32, #tpu.memory_space<smem>>
    %16 = vector.broadcast %15 : f32 to vector<1x8xf32>
    %17 = arith.addf %14, %16 : vector<1x8xf32>
    %c0_15 = arith.constant 0 : index
    %c0_16 = arith.constant 0 : index
    %18 = vector.load %arg8[%c0_15, %c0_16] : memref<1x8xf32, #tpu.memory_space<vmem>>, vector<1x8xf32>
    tpu.vector_store %arg8[%c0_15, %c0_16], %17 {strides = array<i32>} : memref<1x8xf32, #tpu.memory_space<vmem>>, vector<1x8xf32>,
    return
  }
  func.func @transform_0(%arg0: i32) -> (i32, i32) {
    %c0_i32 = arith.constant 0 : i32
    %c0_i32_0 = arith.constant 0 : i32
    return %arg0, %c0_i32 : i32, i32
  }
  func.func @transform_1(%arg0: i32) -> (i32, i32) {
    %c0_i32 = arith.constant 0 : i32
    %c0_i32_0 = arith.constant 0 : i32
    return %arg0, %c0_i32 : i32, i32
  }
  func.func @transform_2(%arg0: i32) -> (i32, i32) {
    %c0_i32 = arith.constant 0 : i32
    %c0_i32_0 = arith.constant 0 : i32
    %c0_i32_1 = arith.constant 0 : i32
    return %c0_i32, %c0_i32_0 : i32, i32
  }
  func.func @transform_3(%arg0: i32) -> (i32, i32) {
    %c0_i32 = arith.constant 0 : i32
    %c0_i32_0 = arith.constant 0 : i32
    %c0_i32_1 = arith.constant 0 : i32
    return %c0_i32, %c0_i32_0 : i32, i32
  }
  func.func @transform_4(%arg0: i32) -> (i32, i32) {
    %c0_i32 = arith.constant 0 : i32
    %c0_i32_0 = arith.constant 0 : i32
    %c0_i32_1 = arith.constant 0 : i32
    return %c0_i32, %c0_i32_0 : i32, i32
  }
  func.func @transform_5(%arg0: i32) -> (i32, i32) {
    %c0_i32 = arith.constant 0 : i32
    %c0_i32_0 = arith.constant 0 : i32
    %c0_i32_1 = arith.constant 0 : i32
    return %c0_i32, %c0_i32_0 : i32, i32
  }
  func.func @transform_6(%arg0: i32) -> i32 {
    %c0_i32 = arith.constant 0 : i32
    %c0_i32_0 = arith.constant 0 : i32
    return %c0_i32 : i32
  }
  func.func @transform_7(%arg0: i32) -> (i32, i32) {
    %c0_i32 = arith.constant 0 : i32
    %c0_i32_0 = arith.constant 0 : i32
    return %c0_i32, %arg0 : i32, i32
  }
}

</mosaic_0001>

<bundles_post_ra>
// kernel: mlp2_forward.1
= control target key start
LH: loop header
LB: loop body
LE: loop exit
PB: predicated region body
PF: predicated region fallthrough
CT: control target
= control target key end

     0   :  { %v359_v2 = vmov 0.0   ;;  %s448_s0 = inlined_call_operand.vmem [shape: f32[8,32], index: 0, kind: input, shape index: {}]   ;;  %s449_s1 = inlined_call_operand.vmem [shape: f32[8,32], index: 1, kind: input, shape index: {}]   ;;  %s450_s2 = inlined_call_operand.vmem [shape: f32[32,32], index: 2, kind: input, shape index: {}]   ;;  %s451_s3 = inlined_call_operand.vmem [shape: f32[32,32], index: 3, kind: input, shape index: {}]   ;;  %s452_s4 = inlined_call_operand.vmem [shape: f32[1,32], index: 4, kind: input, shape index: {}]   ;;  %s453_s5 = inlined_call_operand.vmem [shape: f32[1,32], index: 5, kind: input, shape index: {}]   ;;  %s454_s6 = inlined_call_operand.<no memory space> [shape: f32[1], index: 6, kind: input, shape index: {}]   ;;  %s455_s7 = inlined_call_operand.hbm [shape: f32[1,8], index: 7, kind: output, shape index: {}]  }
   0x1   :  { %v37_v0 = vld [vmem:[%s451_s3 + $0x18] sm:$0xff]  ;;  %307 = vmatprep.subr.mxu0 %v359_v2  ;;  %318 = vmatprep.subr.mxu1 %v359_v2  ;;  %v36_v3 = vld [vmem:[%s451_s3 + $0x10] sm:$0xff]  ;;  %v35_v5 = vld [vmem:[%s451_s3 + $0x8] sm:$0xff] }
   0x2   :  { %v32_v1 = vld [vmem:[%s450_s2 + $0x18] sm:$0xff]  ;;  %v31_v4 = vld [vmem:[%s450_s2 + $0x10] sm:$0xff]  ;;  %308 = vmatpush3.msra.mxu0 %v37_v0  ;;  %v30_v6 = vld [vmem:[%s450_s2 + $0x8] sm:$0xff] }
   0x3   :  { %319 = vmatpush3.msra.mxu1 %v32_v1  ;;  %309 = vmatprep.subr.mxu0 %v359_v2 }
   0x4   :  { %320 = vmatprep.subr.mxu1 %v359_v2 }
   0x5   :  { %13 = vsyncpa [#allocation4], 0  ;;  %310 = vmatpush3.msra.mxu0 %v36_v3  ;;  %321 = vmatpush3.msra.mxu1 %v31_v4  ;;  %v34_v7 = vld [vmem:[%s451_s3] sm:$0xff]  ;;  %vm38_vm0 = vcmask 261120   ;;  %vm360_vm1 = vmmov 0   ;;  %v197_v21 = vstv %s454_s6  ;;  %s361_s23 = smov [#allocation3]  }
   0x6   :  { %311 = vmatprep.subr.mxu0 %v359_v2  ;;  %322 = vmatprep.subr.mxu1 %v359_v2  ;;  %v29_v8 = vld [vmem:[%s450_s2] sm:$0xff]  ;;  %vm274_vm2 = vcmask 57344  }
   0x7   :  { %312 = vmatpush3.msra.mxu0 %v35_v5  ;;  %323 = vmatpush3.msra.mxu1 %v30_v6  ;;  %v33_v9 = vld [vmem:[%s449_s1] sm:$0xff] }
   0x8   :  { %313 = vmatprep.subr.mxu0 %v359_v2  ;;  %324 = vmatprep.subr.mxu1 %v359_v2  ;;  %v28_v10 = vld [vmem:[%s448_s0] sm:$0xff] }
   0x9   :  { %314 = vmatpush3.msra.mxu0 %v34_v7  ;;  %315 = vmatprep.mubr.msk.f32.mxu0 %vm360_vm1, %v359_v2  ;;  %v292_v13 = vld [vmem:[%s452_s4] ss:$0 sm:$0xff]  ;;  %s282_s4 = sshll.u32 %s361_s23, 4  ;;  %s283_s4 = int_to_ptr.vmem [resolvable:$true] %s282_s4 }
   0xa   :  { %325 = vmatpush3.msra.mxu1 %v29_v8  ;;  %326 = vmatprep.mubr.msk.f32.mxu1 %vm360_vm1, %v359_v2  ;;  %v195_v20 = vld [vmem:[%s453_s5] sm:$0x1]  ;;  %s337_s24 = scalar_lea.vmem %s283_s4, 16  ;;  %s341_s25 = scalar_lea.vmem %s283_s4, 32 }
   0xb   :  { %316 = vmatmul.mubr.msk.f32.vlgmr.msra.gmra.mxu0 %vm38_vm0, %v33_v9  ;;  %327 = vmatmul.mubr.msk.f32.vlgmr.msra.gmra.mxu1 %vm38_vm0, %v28_v10  ;;  %p338_p0 = scmp.ne.s32.totalorder %s283_s4, %s337_s24  ;;  %p342_p1 = scmp.lt.s32.totalorder %s283_s4, %s283_s4 }
   0xc   :  { %329 = vmatprep.subr.mxu0 %v359_v2  ;;  %331 = vmatprep.mubr.msk.f32.mxu0 %vm360_vm1, %v359_v2  ;;  %p343_p2 = scmp.lt.s32.totalorder %s341_s25, %s337_s24 }
   0xe   :  { %p344_p3 = por %p343_p2, %p342_p1 }
  0x10   :  { %p345_p4 = pnand %p344_p3, %p338_p0 }
  0xcb   :  { %v108_v11 = vpop.f32.mrf.mxu0  ;;  %v181_v12 = vpop.f32.mrf.mxu1 }
  0xcc   :  { %v182_v14 = vadd.f32 %v181_v12, %v108_v11 }
  0xcd   :  { %v317_v15 = vpop.f32.mrf.mxu0  ;;  %v328_v16 = vpop.f32.mrf.mxu1 }
  0xce   :  { %v192_v17 = vadd.f32 %v292_v13, %v182_v14 }
  0xd0   :  { %v193_v18 = vmul.f32 0.01, %v192_v17 }
  0xd2   :  { %v194_v19 = vmax.f32 %v192_v17, %v193_v18 }
  0xd4   :  { %330 = vmatpush3.xpose.msk.msra.mxu0 %vm38_vm0, %v194_v19 }
  0xd7   :  { %332 = vmatmul.mubr.msk.f32.vlgmr.msra.gmra.mxu0 %vm38_vm0, %v195_v20 }
 0x197   :  { %v270_v22 = vpop.f32.mrf.mxu0 }
 0x198   :  { %v271_v23 = vadd.f32 %v270_v22, %v197_v21 }
 0x199   :  { %v333_v24 = vpop.f32.mrf.mxu0 }
 0x19a   :  { %275 = vst.msk [vmem:[#allocation3] sm:$0x1] %vm274_vm2, %v271_v23 }
 0x19b   :  { %348 = shalt.err (!%p345_p4)
}
 0x19c   :  { %285 = dma.vmem_to_hbm [thread:$0]  %s283_s4, 16, %s455_s7, [#allocation4]  }
 0x19d   :  { %357 = dma.done.wait [#allocation4], 16  }
 0x19e   :  { %358 = vsyncadd [#allocation4], 4294967280 }
 0x19f   :  { %289 = vsyncpa [#allocation4], 1 }

</bundles_post_ra>
